<compile_context>
chip_gen: v5e
topology: v5e:2x2
jax: 0.10.0
libtpu: 0.0.40
codegen_flags: <defaults>
</compile_context>

<pallas_src>
import jax
import jax.numpy as jnp
from jax.experimental import pallas as pl
from jax.experimental.pallas import tpu as pltpu

MAX_LEN = 12    # max_len in the reference module (unused: BERT not implemented)
HIDDEN = 768    # BERT hidden size
DIM = 20        # self.dim default
NPAD = 128      # lane-dense padded output width (col NPAD-1 carries distance)


def _round_up(x, m):
    return ((x + m - 1) // m) * m


def _head_kernel(pooled_ref, w_ref, b_ref, true_ref, out_ref):
    # pooled_ref: (TB, 768) bf16 ; w_ref: (768, NPAD) bf16 ; b_ref: (1, NPAD) f32
    # true_ref:   (TB, NPAD) f32 ; out_ref: (TB, NPAD) f32
    lin = jnp.dot(pooled_ref[...], w_ref[...],
                  preferred_element_type=jnp.float32) + b_ref[...]
    # Padded columns of w/b/true are zero, so they contribute 0 to the L1 sum.
    dist = jnp.sum(jnp.abs(lin - true_ref[...]), axis=1, keepdims=True)  # (TB,1)
    col = jax.lax.broadcasted_iota(jnp.int32, lin.shape, 1)
    out_ref[...] = jnp.where(col == (lin.shape[1] - 1), dist, lin)


def transe_rel_head(pooled_output, weight, bias, true_linear_output, *, tb=1024):
    """Fused Linear(768->dim) + L1-distance head.

    Returns (distance, linear_output) exactly like the PyTorch forward
    (mode='general').  `weight` is (768, dim) (transposed vs torch's (dim,768)),
    `bias` is (dim,).
    """
    B, hidden = pooled_output.shape
    dim = weight.shape[1]
    assert dim < NPAD - 1, "distance column must not overlap real outputs"

    # Zero-pad RHS / true to lane-dense NPAD columns (padding contributes 0).
    w_pad = jnp.zeros((hidden, NPAD), jnp.bfloat16)
    w_pad = w_pad.at[:, :dim].set(weight.astype(jnp.bfloat16))
    b_pad = jnp.zeros((1, NPAD), jnp.float32)
    b_pad = b_pad.at[:, :dim].set(bias.astype(jnp.float32).reshape(1, dim))
    t_pad = jnp.zeros((B, NPAD), jnp.float32)
    t_pad = t_pad.at[:, :dim].set(true_linear_output.astype(jnp.float32))

    pooled_bf16 = pooled_output.astype(jnp.bfloat16)  # dominant HBM traffic

    TB = min(tb, _round_up(B, 8))
    grid = (pl.cdiv(B, TB),)

    out = pl.pallas_call(
        _head_kernel,
        out_shape=jax.ShapeDtypeStruct((B, NPAD), jnp.float32),
        grid=grid,
        in_specs=[
            pl.BlockSpec((TB, hidden), lambda i: (i, 0)),     # pooled tile
            pl.BlockSpec((hidden, NPAD), lambda i: (0, 0)),   # weight (resident)
            pl.BlockSpec((1, NPAD), lambda i: (0, 0)),        # bias   (resident)
            pl.BlockSpec((TB, NPAD), lambda i: (i, 0)),       # true tile
        ],
        out_specs=pl.BlockSpec((TB, NPAD), lambda i: (i, 0)),
        compiler_params=pltpu.CompilerParams(
            dimension_semantics=("parallel",)),
        cost_estimate=pl.CostEstimate(
            flops=2 * B * hidden * NPAD,
            transcendentals=0,
            bytes_accessed=(B * hidden * 2            # pooled bf16
                            + hidden * NPAD * 2       # weight bf16
                            + NPAD * 4                # bias
                            + B * NPAD * 4            # true
                            + B * NPAD * 4)),         # out
    )(pooled_bf16, w_pad, b_pad, t_pad)

    distance = out[:, NPAD - 1]
    linear_output = out[:, :dim]
    return distance, linear_output


def _reference(pooled, weight, bias, true_out):
    lin = pooled @ weight + bias
    dist = jnp.sum(jnp.abs(lin - true_out), axis=1)
    return dist, lin


if __name__ == "__main__":
    key = jax.random.PRNGKey(0)
    k_pool, k_w, k_b, k_true, k_pool2, k_true2 = jax.random.split(key, 6)

    bound = 1.0 / jnp.sqrt(jnp.float32(HIDDEN))
    weight = jax.random.uniform(k_w, (HIDDEN, DIM), jnp.float32, -bound, bound)
    bias = jax.random.uniform(k_b, (DIM,), jnp.float32, -bound, bound)

    # --- small batch (matches the module's typical usage) ---------------------
    B = 8
    pooled_output = jax.random.normal(k_pool, (B, HIDDEN), dtype=jnp.float32)
    true_linear_output = jax.random.normal(k_true, (B, DIM), dtype=jnp.float32)

    distance, linear_output = transe_rel_head(
        pooled_output, weight, bias, true_linear_output)
    jax.block_until_ready((distance, linear_output))

    dist_ref, lin_ref = _reference(pooled_output, weight, bias,
                                   true_linear_output)
    assert linear_output.shape == (B, DIM)
    assert distance.shape == (B,)
    # bf16 inputs (f32 accumulation) -> relaxed tolerance vs pure-f32 reference.
    assert jnp.allclose(linear_output, lin_ref, atol=5e-2, rtol=5e-2)
    assert jnp.allclose(distance, dist_ref, atol=2e-1, rtol=5e-2)

    # --- larger batch: exercises the multi-step pipelined grid ---------------
    B2 = 2048
    pooled2 = jax.random.normal(k_pool2, (B2, HIDDEN), dtype=jnp.float32)
    true2 = jax.random.normal(k_true2, (B2, DIM), dtype=jnp.float32)
    dist2, lin2 = transe_rel_head(pooled2, weight, bias, true2, tb=1024)
    jax.block_until_ready((dist2, lin2))

    dist2_ref, lin2_ref = _reference(pooled2, weight, bias, true2)
    assert lin2.shape == (B2, DIM) and dist2.shape == (B2,)
    assert jnp.allclose(lin2, lin2_ref, atol=5e-2, rtol=5e-2)
    assert jnp.allclose(dist2, dist2_ref, atol=2e-1, rtol=5e-2)

    print("KERNEL_OK")
</pallas_src>

<mosaic_0001>
module attributes {stable_mosaic.version = 11 : i64} {
  func.func @_head_kernel(%arg0: i32, %arg1: memref<8x768xbf16, #tpu.memory_space<vmem>>, %arg2: memref<768x128xbf16, #tpu.memory_space<vmem>>, %arg3: memref<1x128xf32, #tpu.memory_space<vmem>>, %arg4: memref<8x128xf32, #tpu.memory_space<vmem>>, %arg5: memref<8x128xf32, #tpu.memory_space<vmem>>) attributes {dimension_semantics = [#tpu.dimension_semantics<parallel>], iteration_bounds = array<i64: 1>, scalar_prefetch = 0 : i64, scratch_operands = 0 : i64, tpu.core_type = #tpu.core_type<tc>, window_params = [{transform_indices = @transform_0, window_bounds = array<i64: 8, 768>}, {pipeline_mode = #tpu.pipeline_mode<synchronous>, transform_indices = @transform_1, window_bounds = array<i64: 768, 128>}, {pipeline_mode = #tpu.pipeline_mode<synchronous>, transform_indices = @transform_2, window_bounds = array<i64: 1, 128>}, {transform_indices = @transform_3, window_bounds = array<i64: 8, 128>}, {transform_indices = @transform_4, window_bounds = array<i64: 8, 128>}]} {
    %c0 = arith.constant 0 : index
    %c0_0 = arith.constant 0 : index
    %0 = vector.load %arg1[%c0, %c0_0] : memref<8x768xbf16, #tpu.memory_space<vmem>>, vector<8x768xbf16>
    %c0_1 = arith.constant 0 : index
    %c0_2 = arith.constant 0 : index
    %1 = vector.load %arg2[%c0_1, %c0_2] : memref<768x128xbf16, #tpu.memory_space<vmem>>, vector<768x128xbf16>
    %cst = arith.constant dense<0.000000e+00> : vector<8x128xf32>
    %2 = tpu.matmul %0, %1, %cst {dimension_numbers = #tpu.dot_dimension_numbers<[1], [0], [0], [1], [0, 0, 1, 1], [], []>} : vector<8x768xbf16>, vector<768x128xbf16>, vector<8x128xf32> -> vector<8x128xf32>
    %c0_3 = arith.constant 0 : index
    %c0_4 = arith.constant 0 : index
    %3 = vector.load %arg3[%c0_3, %c0_4] : memref<1x128xf32, #tpu.memory_space<vmem>>, vector<1x128xf32>
    %4 = vector.broadcast %3 : vector<1x128xf32> to vector<8x128xf32>
    %5 = arith.addf %2, %4 : vector<8x128xf32>
    %c0_5 = arith.constant 0 : index
    %c0_6 = arith.constant 0 : index
    %6 = vector.load %arg4[%c0_5, %c0_6] : memref<8x128xf32, #tpu.memory_space<vmem>>, vector<8x128xf32>
    %7 = arith.subf %5, %6 : vector<8x128xf32>
    %8 = math.absf %7 : vector<8x128xf32>
    %cst_7 = arith.constant dense<0.000000e+00> : vector<8xf32>
    %9 = vector.multi_reduction <add>, %8, %cst_7 [1] : vector<8x128xf32> to vector<8xf32>
    %10 = vector.shape_cast %9 : vector<8xf32> to vector<8x1xf32>
    %11 = tpu.iota {dimensions = array<i32: 1>} : vector<8x128xi32>
    %c127_i32 = arith.constant 127 : i32
    %12 = vector.broadcast %c127_i32 : i32 to vector<8x128xi32>
    %13 = arith.cmpi eq, %11, %12 : vector<8x128xi32>
    %14 = vector.shape_cast %10 : vector<8x1xf32> to vector<8x1xf32>
    %15 = vector.broadcast %14 : vector<8x1xf32> to vector<8x128xf32>
    %16 = arith.select %13, %15, %5 : vector<8x128xi1>, vector<8x128xf32>
    %c0_8 = arith.constant 0 : index
    %c0_9 = arith.constant 0 : index
    %17 = vector.load %arg5[%c0_8, %c0_9] : memref<8x128xf32, #tpu.memory_space<vmem>>, vector<8x128xf32>
    tpu.vector_store %arg5[%c0_8, %c0_9], %16 {strides = array<i32>} : memref<8x128xf32, #tpu.memory_space<vmem>>, vector<8x128xf32>,
    return
  }
  func.func @transform_0(%arg0: i32) -> (i32, i32) {
    %c0_i32 = arith.constant 0 : i32
    %c0_i32_0 = arith.constant 0 : i32
    return %arg0, %c0_i32 : i32, i32
  }
  func.func @transform_1(%arg0: i32) -> (i32, i32) {
    %c0_i32 = arith.constant 0 : i32
    %c0_i32_0 = arith.constant 0 : i32
    %c0_i32_1 = arith.constant 0 : i32
    return %c0_i32, %c0_i32_0 : i32, i32
  }
  func.func @transform_2(%arg0: i32) -> (i32, i32) {
    %c0_i32 = arith.constant 0 : i32
    %c0_i32_0 = arith.constant 0 : i32
    %c0_i32_1 = arith.constant 0 : i32
    return %c0_i32, %c0_i32_0 : i32, i32
  }
  func.func @transform_3(%arg0: i32) -> (i32, i32) {
    %c0_i32 = arith.constant 0 : i32
    %c0_i32_0 = arith.constant 0 : i32
    return %arg0, %c0_i32 : i32, i32
  }
  func.func @transform_4(%arg0: i32) -> (i32, i32) {
    %c0_i32 = arith.constant 0 : i32
    %c0_i32_0 = arith.constant 0 : i32
    return %arg0, %c0_i32 : i32, i32
  }
}

</mosaic_0001>

<bundles_post_ra>
// kernel: tpu_custom_call.1
= control target key start
LH: loop header
LB: loop body
LE: loop exit
PB: predicated region body
PF: predicated region fallthrough
CT: control target
= control target key end

     0   :  { %9 = vsyncpa [#allocation3], 0  ;;  %s974_s0 = inlined_call_operand.hbm [shape: bf16[8,768], index: 0, kind: input, shape index: {}]   ;;  %s975_s1 = inlined_call_operand.hbm [shape: bf16[768,128], index: 1, kind: input, shape index: {}]   ;;  %s976_s2 = inlined_call_operand.vmem [shape: f32[1,128], index: 2, kind: input, shape index: {}]   ;;  %s977_s3 = inlined_call_operand.hbm [shape: f32[8,128], index: 3, kind: input, shape index: {}]   ;;  %s978_s4 = inlined_call_operand.hbm [shape: f32[8,128], index: 4, kind: output, shape index: {}]  }
   0x1   :  { %10 = vsyncpa [#allocation6], 0  ;;  %s27_s17 = sshll.u32 %s975_s1, 4  ;;  %s28_s17 = int_to_ptr.hbm [resolvable:$true] %s27_s17 }
   0x2   :  { %11 = vsyncpa [#allocation4], 0  ;;  %s928_s18 = smov [#allocation5]   ;;  %s17_s22 = sshll.u32 %s974_s0, 4  ;;  %s18_s22 = int_to_ptr.hbm [resolvable:$true] %s17_s22 }
   0x3   :  { %s29_s19 = sshll.u32 %s928_s18, 4  ;;  %s929_s23 = smov 64   ;;  %s30_s19 = int_to_ptr.vmem [resolvable:$true] %s29_s19 }
   0x4   :  { %s930_s24 = smov 4   ;;  %s931_s25 = smov [#allocation2]  }
   0x5   :  { %35 = dma.hbm_to_vmem [thread:$0]  %s28_s17, 6144, %s30_s19, [#allocation6], %s929_s23, %s929_s23, %s930_s24  }
   0x6   :  { %s19_s26 = sshll.u32 %s931_s25, 4  ;;  %s43_s29 = sshll.u32 %s977_s3, 4  ;;  %s20_s26 = int_to_ptr.vmem [resolvable:$true] %s19_s26  ;;  %s44_s29 = int_to_ptr.hbm [resolvable:$true] %s43_s29 }
   0x7   :  { %22 = dma.hbm_to_vmem [thread:$0]  %s18_s22, 384, %s20_s26, [#allocation3]  }
   0x8   :  { %s932_s1 = smov [#allocation7]  }
   0x9   :  { %s45_s30 = sshll.u32 %s932_s1, 4  ;;  %s46_s30 = int_to_ptr.vmem [resolvable:$true] %s45_s30 }
   0xa   :  { %48 = dma.hbm_to_vmem [thread:$0]  %s44_s29, 128, %s46_s30, [#allocation6]  }
   0xb   :  { %922 = dma.done.wait [#allocation3], 384  }
   0xc   :  { %923 = vsyncadd [#allocation3], 4294966912 }
   0xd   :  { %924 = dma.done.wait [#allocation6], 6272  }
   0xe   :  { %925 = vsyncadd [#allocation6], 4294961024  ;;  %v778_v0 = vld [vmem:[#allocation5 + $0x38] sm:$0xff]  ;;  %v777_v2 = vld [vmem:[#allocation5 + $0x30] sm:$0xff]  ;;  %s933_s5 = smov [#allocation8]   ;;  %s568_s8 = sshll.u32 %s978_s4, 4  ;;  %s569_s8 = int_to_ptr.hbm [resolvable:$true] %s568_s8 }
   0xf   :  { %v786_v1 = vld [vmem:[#allocation5 + $0x78] sm:$0xff]  ;;  %473 = vmatpush.bf16.msra.mxu0 %v778_v0  ;;  %v785_v3 = vld [vmem:[#allocation5 + $0x70] sm:$0xff]  ;;  %v776_v8 = vld [vmem:[#allocation5 + $0x28] sm:$0xff] }
  0x10   :  { %486 = vmatpush.bf16.msra.mxu1 %v786_v1  ;;  %v794_v4 = vld [vmem:[#allocation5 + $0xb8] sm:$0xff]  ;;  %v793_v6 = vld [vmem:[#allocation5 + $0xb0] sm:$0xff]  ;;  %v784_v9 = vld [vmem:[#allocation5 + $0x68] sm:$0xff] }
  0x11   :  { %v802_v5 = vld [vmem:[#allocation5 + $0xf8] sm:$0xff]  ;;  %499 = vmatpush.bf16.msra.mxu2 %v794_v4  ;;  %v801_v7 = vld [vmem:[#allocation5 + $0xf0] sm:$0xff]  ;;  %v792_v10 = vld [vmem:[#allocation5 + $0xa8] sm:$0xff] }
  0x12   :  { %512 = vmatpush.bf16.msra.mxu3 %v802_v5  ;;  %v800_v11 = vld [vmem:[#allocation5 + $0xe8] sm:$0xff]  ;;  %v775_v12 = vld [vmem:[#allocation5 + $0x20] sm:$0xff]  ;;  %v774_v16 = vld [vmem:[#allocation5 + $0x18] sm:$0xff] }
  0x13   :  { %474 = vmatpush.bf16.msra.mxu0 %v777_v2  ;;  %v783_v13 = vld [vmem:[#allocation5 + $0x60] sm:$0xff]  ;;  %v782_v17 = vld [vmem:[#allocation5 + $0x58] sm:$0xff]  ;;  %v773_v20 = vld [vmem:[#allocation5 + $0x10] sm:$0xff] }
  0x14   :  { %487 = vmatpush.bf16.msra.mxu1 %v785_v3  ;;  %v791_v14 = vld [vmem:[#allocation5 + $0xa0] sm:$0xff]  ;;  %v790_v18 = vld [vmem:[#allocation5 + $0x98] sm:$0xff]  ;;  %v781_v21 = vld [vmem:[#allocation5 + $0x50] sm:$0xff] }
  0x15   :  { %500 = vmatpush.bf16.msra.mxu2 %v793_v6  ;;  %v799_v15 = vld [vmem:[#allocation5 + $0xe0] sm:$0xff]  ;;  %v798_v19 = vld [vmem:[#allocation5 + $0xd8] sm:$0xff]  ;;  %v789_v22 = vld [vmem:[#allocation5 + $0x90] sm:$0xff] }
  0x16   :  { %513 = vmatpush.bf16.msra.mxu3 %v801_v7  ;;  %v797_v23 = vld [vmem:[#allocation5 + $0xd0] sm:$0xff]  ;;  %v772_v24 = vld [vmem:[#allocation5 + $0x8] sm:$0xff]  ;;  %v771_v32 = vld [vmem:[#allocation5] sm:$0xff] }
  0x17   :  { %475 = vmatpush.bf16.msra.mxu0 %v776_v8  ;;  %v780_v25 = vld [vmem:[#allocation5 + $0x48] sm:$0xff]  ;;  %v62_v31 = vld [vmem:[#allocation2 + $0x8] sm:$0xff]  ;;  %v779_v33 = vld [vmem:[#allocation5 + $0x40] sm:$0xff] }
  0x18   :  { %488 = vmatpush.bf16.msra.mxu1 %v784_v9  ;;  %v61_v26 = vld [vmem:[#allocation2] sm:$0xff]  ;;  %v810_v34 = vld [vmem:[#allocation5 + $0x138] sm:$0xff]  ;;  %v787_v36 = vld [vmem:[#allocation5 + $0x80] sm:$0xff]  ;;  %v169_v37 = vunpack.c.l.b16 %v62_v31  ;;  %v170_v40 = vunpack.c.h.b16 %v62_v31 }
  0x19   :  { %501 = vmatpush.bf16.msra.mxu2 %v792_v10  ;;  %v788_v27 = vld [vmem:[#allocation5 + $0x88] sm:$0xff]  ;;  %v167_v28 = vunpack.c.l.b16 %v61_v26  ;;  %v168_v30 = vunpack.c.h.b16 %v61_v26  ;;  %v818_v35 = vld [vmem:[#allocation5 + $0x178] sm:$0xff]  ;;  %v795_v41 = vld [vmem:[#allocation5 + $0xc0] sm:$0xff] }
  0x1a   :  { %514 = vmatpush.bf16.msra.mxu3 %v800_v11  ;;  %v796_v29 = vld [vmem:[#allocation5 + $0xc8] sm:$0xff]  ;;  %v809_v42 = vld [vmem:[#allocation5 + $0x130] sm:$0xff]  ;;  %v175_v44 = vpack.c.b16 %v169_v37, %v169_v37  ;;  %v176_v45 = vpack.c.b16 %v170_v40, %v170_v40  ;;  %v807_v48 = vld [vmem:[#allocation5 + $0x120] sm:$0xff] }
  0x1b   :  { %476 = vmatpush.bf16.msra.mxu0 %v775_v12  ;;  %v173_v38 = vpack.c.b16 %v167_v28, %v167_v28  ;;  %v174_v39 = vpack.c.b16 %v168_v30, %v168_v30  ;;  %v817_v43 = vld [vmem:[#allocation5 + $0x170] sm:$0xff]  ;;  %v808_v46 = vld [vmem:[#allocation5 + $0x128] sm:$0xff]  ;;  %v815_v49 = vld [vmem:[#allocation5 + $0x160] sm:$0xff] }
  0x1c   :  { %489 = vmatpush.bf16.msra.mxu1 %v783_v13  ;;  %v816_v47 = vld [vmem:[#allocation5 + $0x168] sm:$0xff]  ;;  %v806_v50 = vld [vmem:[#allocation5 + $0x118] sm:$0xff]  ;;  %v805_v52 = vld [vmem:[#allocation5 + $0x110] sm:$0xff] }
  0x1d   :  { %502 = vmatpush.bf16.msra.mxu2 %v791_v14  ;;  %v814_v51 = vld [vmem:[#allocation5 + $0x158] sm:$0xff]  ;;  %v813_v53 = vld [vmem:[#allocation5 + $0x150] sm:$0xff]  ;;  %v804_v54 = vld [vmem:[#allocation5 + $0x108] sm:$0xff] }
  0x1e   :  { %515 = vmatpush.bf16.msra.mxu3 %v799_v15  ;;  %v812_v55 = vld [vmem:[#allocation5 + $0x148] sm:$0xff]  ;;  %v63_v56 = vld [vmem:[#allocation2 + $0x10] sm:$0xff]  ;;  %v803_v59 = vld [vmem:[#allocation5 + $0x100] sm:$0xff] }
  0x1f   :  { %477 = vmatpush.bf16.msra.mxu0 %v774_v16  ;;  %v171_v57 = vunpack.c.l.b16 %v63_v56  ;;  %v172_v58 = vunpack.c.h.b16 %v63_v56  ;;  %v811_v60 = vld [vmem:[#allocation5 + $0x140] sm:$0xff]  ;;  %v825_v5 = vld [vmem:[%s976_s2] ss:$0 sm:$0xff]  ;;  %s566_s2 = sshll.u32 %s933_s5, 4  ;;  %s567_s2 = int_to_ptr.vmem [resolvable:$true] %s566_s2 }
  0x20   :  { %490 = vmatpush.bf16.msra.mxu1 %v782_v17  ;;  %v551_v15 = vld [vmem:[#allocation7] sm:$0xff] }
  0x21   :  { %503 = vmatpush.bf16.msra.mxu2 %v790_v18  ;;  %v177_v61 = vpack.c.b16 %v171_v57, %v171_v57  ;;  %v178_v62 = vpack.c.b16 %v172_v58, %v172_v58 }
  0x22   :  { %516 = vmatpush.bf16.msra.mxu3 %v798_v19 }
  0x23   :  { %478 = vmatpush.bf16.msra.mxu0 %v773_v20 }
  0x24   :  { %491 = vmatpush.bf16.msra.mxu1 %v781_v21  ;;  %v556_v21 = vlaneseq }
  0x25   :  { %504 = vmatpush.bf16.msra.mxu2 %v789_v22 }
  0x26   :  { %517 = vmatpush.bf16.msra.mxu3 %v797_v23  ;;  %v557_v22 = vand.u32 127, %v556_v21 }
  0x27   :  { %479 = vmatpush.bf16.msra.mxu0 %v772_v24 }
  0x28   :  { %492 = vmatpush.bf16.msra.mxu1 %v780_v25  ;;  %vm558_vm0 = vcmp.eq.s32.totalorder %v557_v22, 127 }
  0x29   :  { %505 = vmatpush.bf16.msra.mxu2 %v788_v27 }
  0x2a   :  { %518 = vmatpush.bf16.msra.mxu3 %v796_v29 }
  0x2b   :  { %480 = vmatpush.bf16.msra.mxu0 %v771_v32 }
  0x2c   :  { %493 = vmatpush.bf16.msra.mxu1 %v779_v33 }
  0x2d   :  { %506 = vmatpush.bf16.msra.mxu2 %v787_v36 }
  0x2e   :  { %481 = vmatmul.bf16.vlgmr.msra.gmra.mxu0 %v173_v38  ;;  %519 = vmatpush.bf16.msra.mxu3 %v795_v41 }
  0x2f   :  { %525 = vmatpush.bf16.msrb.mxu0 %v810_v34  ;;  %494 = vmatmul.bf16.vlgmr.msra.gmra.mxu1 %v174_v39 }
  0x30   :  { %538 = vmatpush.bf16.msrb.mxu1 %v818_v35  ;;  %507 = vmatmul.bf16.vlgmr.msra.gmra.mxu2 %v175_v44 }
  0x31   :  { %520 = vmatmul.bf16.vlgmr.msra.gmra.mxu3 %v176_v45 }
  0x33   :  { %526 = vmatpush.bf16.msrb.mxu0 %v809_v42 }
  0x34   :  { %539 = vmatpush.bf16.msrb.mxu1 %v817_v43 }
  0x37   :  { %527 = vmatpush.bf16.msrb.mxu0 %v808_v46 }
  0x38   :  { %540 = vmatpush.bf16.msrb.mxu1 %v816_v47 }
  0x3b   :  { %528 = vmatpush.bf16.msrb.mxu0 %v807_v48 }
  0x3c   :  { %541 = vmatpush.bf16.msrb.mxu1 %v815_v49 }
  0x3f   :  { %529 = vmatpush.bf16.msrb.mxu0 %v806_v50 }
  0x40   :  { %542 = vmatpush.bf16.msrb.mxu1 %v814_v51 }
  0x43   :  { %530 = vmatpush.bf16.msrb.mxu0 %v805_v52 }
  0x44   :  { %543 = vmatpush.bf16.msrb.mxu1 %v813_v53 }
  0x47   :  { %531 = vmatpush.bf16.msrb.mxu0 %v804_v54 }
  0x48   :  { %544 = vmatpush.bf16.msrb.mxu1 %v812_v55 }
  0x4b   :  { %532 = vmatpush.bf16.msrb.mxu0 %v803_v59 }
  0x4c   :  { %545 = vmatpush.bf16.msrb.mxu1 %v811_v60 }
  0x4e   :  { %533 = vmatmul.bf16.vlgmr.msrb.gmra.mxu0 %v177_v61 }
  0x4f   :  { %546 = vmatmul.bf16.vlgmr.msrb.gmra.mxu1 %v178_v62 }
  0xab   :  { %v482_v63 = vpop.f32.mrf.mxu0 }
  0xac   :  { %v495_v0 = vpop.f32.mrf.mxu1  ;;  %v483_v6 = vadd.f32 %v825_v5, %v482_v63 }
  0xae   :  { %v496_v9 = vadd.f32 %v495_v0, %v483_v6 }
  0xb3   :  { %v484_v1 = vpop.f32.mrf.mxu0  ;;  %v508_v3 = vpop.f32.mrf.mxu2 }
  0xb4   :  { %v497_v2 = vpop.f32.mrf.mxu1  ;;  %v521_v4 = vpop.f32.mrf.mxu3  ;;  %v509_v10 = vadd.f32 %v508_v3, %v496_v9 }
  0xb6   :  { %v522_v11 = vadd.f32 %v521_v4, %v509_v10 }
  0xbb   :  { %v510_v7 = vpop.f32.mrf.mxu2 }
  0xbc   :  { %v523_v8 = vpop.f32.mrf.mxu3 }
  0xcb   :  { %v534_v12 = vpop.f32.mrf.mxu0 }
  0xcc   :  { %v547_v13 = vpop.f32.mrf.mxu1  ;;  %v535_v14 = vadd.f32 %v534_v12, %v522_v11 }
  0xce   :  { %v548_v16 = vadd.f32 %v547_v13, %v535_v14 }
  0xd0   :  { %v552_v17 = vsub.f32 %v548_v16, %v551_v15 }
  0xd2   :  { %v553_v18 = vand.u32 2147483647, %v552_v17 }
  0xd3   :  { %v536_v19 = vpop.f32.mrf.mxu0 }
  0xd4   :  { %v549_v20 = vpop.f32.mrf.mxu1  ;;  %554 = vadd.xlane.f32.xlu0 %v553_v18 }
 0x147   :  { %v555_v23 = vpop.xlane.xlu0 %554 }
 0x148   :  { %v559_v24 = vsel %vm558_vm0, %v555_v23, %v548_v16 }
 0x149   :  { %560 = vst [vmem:[#allocation8] sm:$0xff] %v559_v24 }
 0x14a   :  { %571 = dma.vmem_to_hbm [thread:$0]  %s567_s2, 128, %s569_s8, [#allocation4]  }
 0x14b   :  { %926 = dma.done.wait [#allocation4], 128  }
 0x14c   :  { %927 = vsyncadd [#allocation4], 4294967168 }
 0x14d   :  { %576 = vsyncpa [#allocation3], 1 }
 0x14e   :  { %577 = vsyncpa [#allocation6], 1 }
 0x14f   :  { %578 = vsyncpa [#allocation4], 1 }

</bundles_post_ra>
